<compile_context>
chip_gen: v7x
topology: tpu7x:2x2x1
jax: 0.10.0
libtpu: 0.0.40
codegen_flags: <defaults>
</compile_context>

<pallas_src>
import functools

import jax
import jax.numpy as jnp
from jax.experimental import pallas as pl
from jax.experimental.pallas import tpu as pltpu


# ----------------------------- helpers --------------------------------------


def _round_up(x: int, m: int) -> int:
    return ((x + m - 1) // m) * m


def _device_kind() -> str:
    try:
        return jax.devices()[0].device_kind.lower()
    except Exception:  # pragma: no cover - defensive
        return ""


def _prefers_256_lanes() -> bool:
    # v5e's MXU is 128x128, so 128 alignment is already native there;
    # v6e/v7x MXUs are 2x256x256 and prefer 256-wide K/N.
    kind = _device_kind()
    return not ("v5 lite" in kind or "v5e" in kind or "v5litepod" in kind)


def _pad_dim(dim: int, *, wide_lanes: bool) -> int:
    # Only pay the 256-alignment padding when the true dim is large enough
    # that the extra zero FLOPs are small.
    lane = 256 if (wide_lanes and dim >= 192) else 128
    return _round_up(dim, lane)


def _vmem_capacity_bytes() -> int:
    try:
        return int(pltpu.get_tpu_info().vmem_capacity_bytes)
    except Exception:  # pragma: no cover - conservative default (v7x per-TC)
        return 64 << 20


# ----------------------------- kernel ----------------------------------------


def _make_mlp_kernel(n_hidden: int, n_chunk: int = 512):
    """Fused MLP kernel: n_hidden * (matmul + shift + relu), then final matmul + bias.

    Ref layout: (x, w_0, s_0, ..., w_{n-1}, s_{n-1}, w_out, b_out, o).
    All matmuls accumulate in f32 on the MXU; activations are cast back to the
    weight dtype (f32 or bf16) before feeding the next matmul.  Layers whose
    (padded) output width exceeds n_chunk lanes are processed in n_chunk-wide
    column chunks to bound the live f32 accumulator.
    """

    def layer(h, w_ref, s_ref, *, act):
        dout = w_ref.shape[1]
        if dout <= n_chunk:
            y = jnp.dot(h, w_ref[...], preferred_element_type=jnp.float32)
            y = y + s_ref[...]
            if act:
                y = jnp.maximum(y, 0.0).astype(w_ref.dtype)
            return y
        pieces = []
        for j in range(0, dout, n_chunk):
            n = min(n_chunk, dout - j)
            y = jnp.dot(h, w_ref[:, j:j + n], preferred_element_type=jnp.float32)
            y = y + s_ref[:, j:j + n]
            if act:
                y = jnp.maximum(y, 0.0).astype(w_ref.dtype)
            pieces.append(y)
        return jnp.concatenate(pieces, axis=1)

    def kernel(*refs):
        x_ref = refs[0]
        o_ref = refs[-1]
        w_out_ref = refs[-3]
        b_out_ref = refs[-2]

        h = x_ref[...]
        for i in range(n_hidden):
            h = layer(h, refs[1 + 2 * i], refs[2 + 2 * i], act=True)

        o_ref[...] = layer(h, w_out_ref, b_out_ref, act=False).astype(o_ref.dtype)

    return kernel


# ----------------------------- wrapper ---------------------------------------


@functools.partial(
    jax.jit,
    static_argnames=("dim_out", "bm", "out_dtype", "single_buffer_weights"),
)
def _mlp_forward_impl(x, hidden, final, *, dim_out: int, bm: int,
                      out_dtype, single_buffer_weights: bool):
    cdt = hidden[0][0].dtype
    odt = jnp.dtype(out_dtype)
    B, din = x.shape
    din_p = hidden[0][0].shape[0]   # padded input feature dim expected by W_0

    # ---- batch tiling ----
    # bf16 vregs pack 16 sublanes; f32 pack 8.
    sub = 16 if cdt == jnp.bfloat16 else 8
    B_r = _round_up(B, sub)
    bm_eff = min(bm, B_r)
    B_pad = _round_up(B_r, bm_eff)
    # Prefer >= 2 grid steps so dimension_semantics=("parallel",) can feed both
    # v7x TensorCores when the batch is large enough.
    if bm_eff > 128 and B_pad // bm_eff < 2:
        bm_eff = _round_up((bm_eff + 1) // 2, sub)
        B_pad = _round_up(B_r, bm_eff)

    xp = x.astype(cdt)
    if B_pad != B or din_p != din:
        xp = jnp.pad(xp, ((0, B_pad - B), (0, din_p - din)))

    wf, bf = final
    dout_p = wf.shape[1]
    n_hidden = len(hidden)

    # Weights/shifts never change across the batch grid -> single-buffer them.
    const_kwargs = {"pipeline_mode": pl.Buffered(1)} if single_buffer_weights else {}

    flat = []
    in_specs = [pl.BlockSpec((bm_eff, din_p), lambda i: (i, 0))]
    for (w, s) in hidden:
        in_specs.append(pl.BlockSpec(w.shape, lambda i: (0, 0), **const_kwargs))
        in_specs.append(pl.BlockSpec(s.shape, lambda i: (0, 0), **const_kwargs))
        flat += [w, s]
    in_specs.append(pl.BlockSpec(wf.shape, lambda i: (0, 0), **const_kwargs))
    in_specs.append(pl.BlockSpec(bf.shape, lambda i: (0, 0), **const_kwargs))
    flat += [wf, bf]

    out_specs = pl.BlockSpec((bm_eff, dout_p), lambda i: (i, 0))   # lane-dense output

    # ---- VMEM budget ----
    weight_bytes = sum(a.size * a.dtype.itemsize for a in flat)
    x_blk = bm_eff * din_p * xp.dtype.itemsize
    o_blk = bm_eff * dout_p * odt.itemsize
    widest = max([w.shape[1] for (w, _) in hidden] + [dout_p, din_p])
    # f32 accumulator + one compute-dtype activation temp.
    act_bytes = bm_eff * widest * (4 + jnp.dtype(cdt).itemsize)
    w_mult = 1 if single_buffer_weights else 2
    est = 2 * (x_blk + o_blk) + w_mult * weight_bytes + act_bytes
    vmem_cap = _vmem_capacity_bytes()
    vmem_limit = int(min(max(est + (8 << 20), 32 << 20), int(0.8 * vmem_cap)))
    # TODO(synk): if weight_bytes > ~0.6 * vmem_cap, the fully fused path won't
    #             fit (v7x first); that case needs the K/N weight-streaming
    #             path described at the top of the file.

    # ---- advisory cost estimate ----
    flops = 0
    for (w, _) in hidden:
        flops += 2 * B_pad * w.shape[0] * w.shape[1]
    flops += 2 * B_pad * wf.shape[0] * wf.shape[1]
    bytes_accessed = (B_pad * din_p * xp.dtype.itemsize
                      + weight_bytes
                      + B_pad * dout_p * odt.itemsize)
    cost = pl.CostEstimate(flops=flops, transcendentals=0,
                           bytes_accessed=bytes_accessed)

    out = pl.pallas_call(
        _make_mlp_kernel(n_hidden),
        out_shape=jax.ShapeDtypeStruct((B_pad, dout_p), odt),
        grid=(B_pad // bm_eff,),
        in_specs=in_specs,
        out_specs=out_specs,
        compiler_params=pltpu.CompilerParams(
            dimension_semantics=("parallel",),
            vmem_limit_bytes=vmem_limit,
        ),
        cost_estimate=cost,
    )(xp, *flat)

    return out[:B, :dim_out]


def mlp_forward(x, hidden, final, *, dim_out: int, bm: int = 256,
                out_dtype=jnp.float32):
    """Run the fused MLP. `hidden` = [(w, s), ...], `final` = (w, b), all padded."""
    try:
        return _mlp_forward_impl(x, hidden, final, dim_out=dim_out, bm=bm,
                                 out_dtype=out_dtype, single_buffer_weights=True)
    except Exception:
        # TODO(synk): drop this fallback once Buffered(1) single-buffering of
        #             constant operands is supported everywhere we run.
        return _mlp_forward_impl(x, hidden, final, dim_out=dim_out, bm=bm,
                                 out_dtype=out_dtype, single_buffer_weights=False)


# ----------------------------- parameters ------------------------------------


def init_raw_params(key, dim_in, dim_out, dim_hid, n_hid, eps=1e-5):
    """PyTorch-shaped parameters: Linear(W (out,in), b), BN(gamma, beta, mean, var)."""
    hidden = []
    dims = [(dim_in, dim_hid)] + [(dim_hid, dim_hid)] * n_hid
    for din, dout in dims:
        key, kw, kb, kg, kbe, km, kv = jax.random.split(key, 7)
        bound = 1.0 / (din ** 0.5)
        hidden.append(
            dict(
                w=jax.random.uniform(kw, (dout, din), jnp.float32, -bound, bound),
                b=jax.random.uniform(kb, (dout,), jnp.float32, -bound, bound),
                gamma=1.0 + 0.1 * jax.random.normal(kg, (dout,), jnp.float32),
                beta=0.1 * jax.random.normal(kbe, (dout,), jnp.float32),
                mean=0.1 * jax.random.normal(km, (dout,), jnp.float32),
                var=1.0 + 0.1 * jax.random.uniform(kv, (dout,), jnp.float32),
            )
        )
    key, kw, kb = jax.random.split(key, 3)
    bound = 1.0 / (dim_hid ** 0.5)
    final = dict(
        w=jax.random.uniform(kw, (dim_out, dim_hid), jnp.float32, -bound, bound),
        b=jax.random.uniform(kb, (dim_out,), jnp.float32, -bound, bound),
    )
    return dict(hidden=hidden, final=final, eps=eps)


def fold_and_pad_params(raw, compute_dtype=jnp.float32, wide_lanes=None):
    """Fold BN + bias into (W', s'), pre-transpose, zero-pad features lane-dense.

    Pads the input feature dim as well as all hidden/output dims; uses 256-wide
    padding on 256x256-MXU generations (v6e/v7x) when the dim is large enough,
    128-wide otherwise.  Shifts/bias stay f32 (added to the f32 accumulator).
    """
    if wide_lanes is None:
        wide_lanes = _prefers_256_lanes()
    eps = raw["eps"]
    din0 = raw["hidden"][0]["w"].shape[1]
    in_w = _pad_dim(din0, wide_lanes=wide_lanes)       # padded K for layer 0 (and x)
    hidden = []
    for p in raw["hidden"]:
        dout, din = p["w"].shape
        scale = p["gamma"] / jnp.sqrt(p["var"] + eps)
        w_f = p["w"].T * scale[None, :]                       # (din, dout)
        s_f = p["beta"] + (p["b"] - p["mean"]) * scale        # (dout,)
        dout_p = _pad_dim(dout, wide_lanes=wide_lanes)
        w_pad = jnp.zeros((in_w, dout_p), jnp.float32).at[:din, :dout].set(w_f)
        s_pad = jnp.zeros((1, dout_p), jnp.float32).at[0, :dout].set(s_f)
        hidden.append((w_pad.astype(compute_dtype), s_pad))
        in_w = dout_p
    f = raw["final"]
    dout, din = f["w"].shape
    dout_p = _pad_dim(dout, wide_lanes=wide_lanes)
    w_pad = jnp.zeros((in_w, dout_p), jnp.float32).at[:din, :dout].set(f["w"].T)
    b_pad = jnp.zeros((1, dout_p), jnp.float32).at[0, :dout].set(f["b"])
    final = (w_pad.astype(compute_dtype), b_pad)
    return hidden, final


def mlp_reference(x, raw):
    """Pure-JAX reference with explicit eval-mode BatchNorm1d (no folding)."""
    eps = raw["eps"]
    h = x
    for p in raw["hidden"]:
        y = h @ p["w"].T + p["b"]
        y = (y - p["mean"]) / jnp.sqrt(p["var"] + eps) * p["gamma"] + p["beta"]
        h = jnp.maximum(y, 0.0)
    f = raw["final"]
    return h @ f["w"].T + f["b"]


# ----------------------------- main -------------------------------------------


if __name__ == "__main__":
    dim_in, dim_out, dim_hid, n_hid = 16, 8, 32, 2
    batch = 16
    # dropout p is irrelevant in eval mode (identity)

    key = jax.random.PRNGKey(0)
    key, kx, kp = jax.random.split(key, 3)
    x = jax.random.normal(kx, (batch, dim_in), jnp.float32)

    raw = init_raw_params(kp, dim_in, dim_out, dim_hid, n_hid)
    ref = mlp_reference(x, raw)

    # --- f32 path (tight tolerance) ---
    hidden32, final32 = fold_and_pad_params(raw, compute_dtype=jnp.float32)
    out32 = mlp_forward(x, hidden32, final32, dim_out=dim_out)
    out32 = jax.block_until_ready(out32)
    assert out32.shape == (batch, dim_out)
    assert jnp.allclose(out32, ref, atol=1e-4, rtol=1e-4), "f32 kernel mismatch"

    # --- bf16 path (MXU-native on v5e/v6e/v7x; f32 accumulation) ---
    hiddenbf, finalbf = fold_and_pad_params(raw, compute_dtype=jnp.bfloat16)
    outbf = mlp_forward(x, hiddenbf, finalbf, dim_out=dim_out)
    outbf = jax.block_until_ready(outbf)
    assert outbf.shape == (batch, dim_out)
    assert jnp.allclose(outbf, ref, atol=1e-1, rtol=1e-1), "bf16 kernel mismatch"

    print("KERNEL_OK")
</pallas_src>

<mosaic_0001>
module attributes {stable_mosaic.version = 11 : i64} {
  func.func @kernel(%arg0: i32, %arg1: memref<16x128xf32, #tpu.memory_space<vmem>>, %arg2: memref<128x128xf32, #tpu.memory_space<vmem>>, %arg3: memref<1x128xf32, #tpu.memory_space<vmem>>, %arg4: memref<128x128xf32, #tpu.memory_space<vmem>>, %arg5: memref<1x128xf32, #tpu.memory_space<vmem>>, %arg6: memref<128x128xf32, #tpu.memory_space<vmem>>, %arg7: memref<1x128xf32, #tpu.memory_space<vmem>>, %arg8: memref<128x128xf32, #tpu.memory_space<vmem>>, %arg9: memref<1x128xf32, #tpu.memory_space<vmem>>, %arg10: memref<16x128xf32, #tpu.memory_space<vmem>>) attributes {dimension_semantics = [#tpu.dimension_semantics<parallel>], iteration_bounds = array<i64: 1>, scalar_prefetch = 0 : i64, scratch_operands = 0 : i64, tpu.core_type = #tpu.core_type<tc>, window_params = [{transform_indices = @transform_0, window_bounds = array<i64: 16, 128>}, {pipeline_mode = #tpu.pipeline_mode<synchronous>, transform_indices = @transform_1, window_bounds = array<i64: 128, 128>}, {pipeline_mode = #tpu.pipeline_mode<synchronous>, transform_indices = @transform_2, window_bounds = array<i64: 1, 128>}, {pipeline_mode = #tpu.pipeline_mode<synchronous>, transform_indices = @transform_3, window_bounds = array<i64: 128, 128>}, {pipeline_mode = #tpu.pipeline_mode<synchronous>, transform_indices = @transform_4, window_bounds = array<i64: 1, 128>}, {pipeline_mode = #tpu.pipeline_mode<synchronous>, transform_indices = @transform_5, window_bounds = array<i64: 128, 128>}, {pipeline_mode = #tpu.pipeline_mode<synchronous>, transform_indices = @transform_6, window_bounds = array<i64: 1, 128>}, {pipeline_mode = #tpu.pipeline_mode<synchronous>, transform_indices = @transform_7, window_bounds = array<i64: 128, 128>}, {pipeline_mode = #tpu.pipeline_mode<synchronous>, transform_indices = @transform_8, window_bounds = array<i64: 1, 128>}, {transform_indices = @transform_9, window_bounds = array<i64: 16, 128>}]} {
    %c0 = arith.constant 0 : index
    %c0_0 = arith.constant 0 : index
    %0 = vector.load %arg1[%c0, %c0_0] : memref<16x128xf32, #tpu.memory_space<vmem>>, vector<16x128xf32>
    %c0_1 = arith.constant 0 : index
    %c0_2 = arith.constant 0 : index
    %1 = vector.load %arg2[%c0_1, %c0_2] : memref<128x128xf32, #tpu.memory_space<vmem>>, vector<128x128xf32>
    %cst = arith.constant dense<0.000000e+00> : vector<16x128xf32>
    %2 = tpu.matmul %0, %1, %cst {dimension_numbers = #tpu.dot_dimension_numbers<[1], [0], [0], [1], [0, 0, 1, 1], [], []>} : vector<16x128xf32>, vector<128x128xf32>, vector<16x128xf32> -> vector<16x128xf32>
    %c0_3 = arith.constant 0 : index
    %c0_4 = arith.constant 0 : index
    %3 = vector.load %arg3[%c0_3, %c0_4] : memref<1x128xf32, #tpu.memory_space<vmem>>, vector<1x128xf32>
    %4 = vector.broadcast %3 : vector<1x128xf32> to vector<16x128xf32>
    %5 = arith.addf %2, %4 : vector<16x128xf32>
    %cst_5 = arith.constant 0.000000e+00 : f32
    %6 = vector.broadcast %cst_5 : f32 to vector<16x128xf32>
    %7 = arith.maximumf %5, %6 : vector<16x128xf32>
    %c0_6 = arith.constant 0 : index
    %c0_7 = arith.constant 0 : index
    %8 = vector.load %arg4[%c0_6, %c0_7] : memref<128x128xf32, #tpu.memory_space<vmem>>, vector<128x128xf32>
    %cst_8 = arith.constant dense<0.000000e+00> : vector<16x128xf32>
    %9 = tpu.matmul %7, %8, %cst_8 {dimension_numbers = #tpu.dot_dimension_numbers<[1], [0], [0], [1], [0, 0, 1, 1], [], []>} : vector<16x128xf32>, vector<128x128xf32>, vector<16x128xf32> -> vector<16x128xf32>
    %c0_9 = arith.constant 0 : index
    %c0_10 = arith.constant 0 : index
    %10 = vector.load %arg5[%c0_9, %c0_10] : memref<1x128xf32, #tpu.memory_space<vmem>>, vector<1x128xf32>
    %11 = vector.broadcast %10 : vector<1x128xf32> to vector<16x128xf32>
    %12 = arith.addf %9, %11 : vector<16x128xf32>
    %cst_11 = arith.constant 0.000000e+00 : f32
    %13 = vector.broadcast %cst_11 : f32 to vector<16x128xf32>
    %14 = arith.maximumf %12, %13 : vector<16x128xf32>
    %c0_12 = arith.constant 0 : index
    %c0_13 = arith.constant 0 : index
    %15 = vector.load %arg6[%c0_12, %c0_13] : memref<128x128xf32, #tpu.memory_space<vmem>>, vector<128x128xf32>
    %cst_14 = arith.constant dense<0.000000e+00> : vector<16x128xf32>
    %16 = tpu.matmul %14, %15, %cst_14 {dimension_numbers = #tpu.dot_dimension_numbers<[1], [0], [0], [1], [0, 0, 1, 1], [], []>} : vector<16x128xf32>, vector<128x128xf32>, vector<16x128xf32> -> vector<16x128xf32>
    %c0_15 = arith.constant 0 : index
    %c0_16 = arith.constant 0 : index
    %17 = vector.load %arg7[%c0_15, %c0_16] : memref<1x128xf32, #tpu.memory_space<vmem>>, vector<1x128xf32>
    %18 = vector.broadcast %17 : vector<1x128xf32> to vector<16x128xf32>
    %19 = arith.addf %16, %18 : vector<16x128xf32>
    %cst_17 = arith.constant 0.000000e+00 : f32
    %20 = vector.broadcast %cst_17 : f32 to vector<16x128xf32>
    %21 = arith.maximumf %19, %20 : vector<16x128xf32>
    %c0_18 = arith.constant 0 : index
    %c0_19 = arith.constant 0 : index
    %22 = vector.load %arg8[%c0_18, %c0_19] : memref<128x128xf32, #tpu.memory_space<vmem>>, vector<128x128xf32>
    %cst_20 = arith.constant dense<0.000000e+00> : vector<16x128xf32>
    %23 = tpu.matmul %21, %22, %cst_20 {dimension_numbers = #tpu.dot_dimension_numbers<[1], [0], [0], [1], [0, 0, 1, 1], [], []>} : vector<16x128xf32>, vector<128x128xf32>, vector<16x128xf32> -> vector<16x128xf32>
    %c0_21 = arith.constant 0 : index
    %c0_22 = arith.constant 0 : index
    %24 = vector.load %arg9[%c0_21, %c0_22] : memref<1x128xf32, #tpu.memory_space<vmem>>, vector<1x128xf32>
    %25 = vector.broadcast %24 : vector<1x128xf32> to vector<16x128xf32>
    %26 = arith.addf %23, %25 : vector<16x128xf32>
    %c0_23 = arith.constant 0 : index
    %c0_24 = arith.constant 0 : index
    %27 = vector.load %arg10[%c0_23, %c0_24] : memref<16x128xf32, #tpu.memory_space<vmem>>, vector<16x128xf32>
    tpu.vector_store %arg10[%c0_23, %c0_24], %26 {strides = array<i32>} : memref<16x128xf32, #tpu.memory_space<vmem>>, vector<16x128xf32>,
    return
  }
  func.func @transform_0(%arg0: i32) -> (i32, i32) {
    %c0_i32 = arith.constant 0 : i32
    %c0_i32_0 = arith.constant 0 : i32
    return %arg0, %c0_i32 : i32, i32
  }
  func.func @transform_1(%arg0: i32) -> (i32, i32) {
    %c0_i32 = arith.constant 0 : i32
    %c0_i32_0 = arith.constant 0 : i32
    %c0_i32_1 = arith.constant 0 : i32
    return %c0_i32, %c0_i32_0 : i32, i32
  }
  func.func @transform_2(%arg0: i32) -> (i32, i32) {
    %c0_i32 = arith.constant 0 : i32
    %c0_i32_0 = arith.constant 0 : i32
    %c0_i32_1 = arith.constant 0 : i32
    return %c0_i32, %c0_i32_0 : i32, i32
  }
  func.func @transform_3(%arg0: i32) -> (i32, i32) {
    %c0_i32 = arith.constant 0 : i32
    %c0_i32_0 = arith.constant 0 : i32
    %c0_i32_1 = arith.constant 0 : i32
    return %c0_i32, %c0_i32_0 : i32, i32
  }
  func.func @transform_4(%arg0: i32) -> (i32, i32) {
    %c0_i32 = arith.constant 0 : i32
    %c0_i32_0 = arith.constant 0 : i32
    %c0_i32_1 = arith.constant 0 : i32
    return %c0_i32, %c0_i32_0 : i32, i32
  }
  func.func @transform_5(%arg0: i32) -> (i32, i32) {
    %c0_i32 = arith.constant 0 : i32
    %c0_i32_0 = arith.constant 0 : i32
    %c0_i32_1 = arith.constant 0 : i32
    return %c0_i32, %c0_i32_0 : i32, i32
  }
  func.func @transform_6(%arg0: i32) -> (i32, i32) {
    %c0_i32 = arith.constant 0 : i32
    %c0_i32_0 = arith.constant 0 : i32
    %c0_i32_1 = arith.constant 0 : i32
    return %c0_i32, %c0_i32_0 : i32, i32
  }
  func.func @transform_7(%arg0: i32) -> (i32, i32) {
    %c0_i32 = arith.constant 0 : i32
    %c0_i32_0 = arith.constant 0 : i32
    %c0_i32_1 = arith.constant 0 : i32
    return %c0_i32, %c0_i32_0 : i32, i32
  }
  func.func @transform_8(%arg0: i32) -> (i32, i32) {
    %c0_i32 = arith.constant 0 : i32
    %c0_i32_0 = arith.constant 0 : i32
    %c0_i32_1 = arith.constant 0 : i32
    return %c0_i32, %c0_i32_0 : i32, i32
  }
  func.func @transform_9(%arg0: i32) -> (i32, i32) {
    %c0_i32 = arith.constant 0 : i32
    %c0_i32_0 = arith.constant 0 : i32
    return %arg0, %c0_i32 : i32, i32
  }
}

module attributes {stable_mosaic.version = 11 : i64} {
  func.func @kernel(%arg0: i32, %arg1: memref<16x128xf32, #tpu.memory_space<vmem>>, %arg2: memref<128x128xf32, #tpu.memory_space<vmem>>, %arg3: memref<1x128xf32, #tpu.memory_space<vmem>>, %arg4: memref<128x128xf32, #tpu.memory_space<vmem>>, %arg5: memref<1x128xf32, #tpu.memory_space<vmem>>, %arg6: memref<128x128xf32, #tpu.memory_space<vmem>>, %arg7: memref<1x128xf32, #tpu.memory_space<vmem>>, %arg8: memref<128x128xf32, #tpu.memory_space<vmem>>, %arg9: memref<1x128xf32, #tpu.memory_space<vmem>>, %arg10: memref<16x128xf32, #tpu.memory_space<vmem>>) attributes {dimension_semantics = [#tpu.dimension_semantics<parallel>], iteration_bounds = array<i64: 1>, scalar_prefetch = 0 : i64, scratch_operands = 0 : i64, tpu.core_type = #tpu.core_type<tc>, window_params = [{transform_indices = @transform_0, window_bounds = array<i64: 16, 128>}, {pipeline_mode = #tpu.pipeline_mode<synchronous>, transform_indices = @transform_1, window_bounds = array<i64: 128, 128>}, {pipeline_mode = #tpu.pipeline_mode<synchronous>, transform_indices = @transform_2, window_bounds = array<i64: 1, 128>}, {pipeline_mode = #tpu.pipeline_mode<synchronous>, transform_indices = @transform_3, window_bounds = array<i64: 128, 128>}, {pipeline_mode = #tpu.pipeline_mode<synchronous>, transform_indices = @transform_4, window_bounds = array<i64: 1, 128>}, {pipeline_mode = #tpu.pipeline_mode<synchronous>, transform_indices = @transform_5, window_bounds = array<i64: 128, 128>}, {pipeline_mode = #tpu.pipeline_mode<synchronous>, transform_indices = @transform_6, window_bounds = array<i64: 1, 128>}, {pipeline_mode = #tpu.pipeline_mode<synchronous>, transform_indices = @transform_7, window_bounds = array<i64: 128, 128>}, {pipeline_mode = #tpu.pipeline_mode<synchronous>, transform_indices = @transform_8, window_bounds = array<i64: 1, 128>}, {transform_indices = @transform_9, window_bounds = array<i64: 16, 128>}]} {
    %c0 = arith.constant 0 : index
    %c0_0 = arith.constant 0 : index
    %0 = vector.load %arg1[%c0, %c0_0] : memref<16x128xf32, #tpu.memory_space<vmem>>, vector<16x128xf32>
    %c0_1 = arith.constant 0 : index
    %c0_2 = arith.constant 0 : index
    %1 = vector.load %arg2[%c0_1, %c0_2] : memref<128x128xf32, #tpu.memory_space<vmem>>, vector<128x128xf32>
    %cst = arith.constant dense<0.000000e+00> : vector<16x128xf32>
    %2 = tpu.matmul %0, %1, %cst {dimension_numbers = #tpu.dot_dimension_numbers<[1], [0], [0], [1], [0, 0, 1, 1], [], []>} : vector<16x128xf32>, vector<128x128xf32>, vector<16x128xf32> -> vector<16x128xf32>
    %c0_3 = arith.constant 0 : index
    %c0_4 = arith.constant 0 : index
    %3 = vector.load %arg3[%c0_3, %c0_4] : memref<1x128xf32, #tpu.memory_space<vmem>>, vector<1x128xf32>
    %4 = vector.broadcast %3 : vector<1x128xf32> to vector<16x128xf32>
    %5 = arith.addf %2, %4 : vector<16x128xf32>
    %cst_5 = arith.constant 0.000000e+00 : f32
    %6 = vector.broadcast %cst_5 : f32 to vector<16x128xf32>
    %7 = arith.maximumf %5, %6 : vector<16x128xf32>
    %c0_6 = arith.constant 0 : index
    %c0_7 = arith.constant 0 : index
    %8 = vector.load %arg4[%c0_6, %c0_7] : memref<128x128xf32, #tpu.memory_space<vmem>>, vector<128x128xf32>
    %cst_8 = arith.constant dense<0.000000e+00> : vector<16x128xf32>
    %9 = tpu.matmul %7, %8, %cst_8 {dimension_numbers = #tpu.dot_dimension_numbers<[1], [0], [0], [1], [0, 0, 1, 1], [], []>} : vector<16x128xf32>, vector<128x128xf32>, vector<16x128xf32> -> vector<16x128xf32>
    %c0_9 = arith.constant 0 : index
    %c0_10 = arith.constant 0 : index
    %10 = vector.load %arg5[%c0_9, %c0_10] : memref<1x128xf32, #tpu.memory_space<vmem>>, vector<1x128xf32>
    %11 = vector.broadcast %10 : vector<1x128xf32> to vector<16x128xf32>
    %12 = arith.addf %9, %11 : vector<16x128xf32>
    %cst_11 = arith.constant 0.000000e+00 : f32
    %13 = vector.broadcast %cst_11 : f32 to vector<16x128xf32>
    %14 = arith.maximumf %12, %13 : vector<16x128xf32>
    %c0_12 = arith.constant 0 : index
    %c0_13 = arith.constant 0 : index
    %15 = vector.load %arg6[%c0_12, %c0_13] : memref<128x128xf32, #tpu.memory_space<vmem>>, vector<128x128xf32>
    %cst_14 = arith.constant dense<0.000000e+00> : vector<16x128xf32>
    %16 = tpu.matmul %14, %15, %cst_14 {dimension_numbers = #tpu.dot_dimension_numbers<[1], [0], [0], [1], [0, 0, 1, 1], [], []>} : vector<16x128xf32>, vector<128x128xf32>, vector<16x128xf32> -> vector<16x128xf32>
    %c0_15 = arith.constant 0 : index
    %c0_16 = arith.constant 0 : index
    %17 = vector.load %arg7[%c0_15, %c0_16] : memref<1x128xf32, #tpu.memory_space<vmem>>, vector<1x128xf32>
    %18 = vector.broadcast %17 : vector<1x128xf32> to vector<16x128xf32>
    %19 = arith.addf %16, %18 : vector<16x128xf32>
    %cst_17 = arith.constant 0.000000e+00 : f32
    %20 = vector.broadcast %cst_17 : f32 to vector<16x128xf32>
    %21 = arith.maximumf %19, %20 : vector<16x128xf32>
    %c0_18 = arith.constant 0 : index
    %c0_19 = arith.constant 0 : index
    %22 = vector.load %arg8[%c0_18, %c0_19] : memref<128x128xf32, #tpu.memory_space<vmem>>, vector<128x128xf32>
    %cst_20 = arith.constant dense<0.000000e+00> : vector<16x128xf32>
    %23 = tpu.matmul %21, %22, %cst_20 {dimension_numbers = #tpu.dot_dimension_numbers<[1], [0], [0], [1], [0, 0, 1, 1], [], []>} : vector<16x128xf32>, vector<128x128xf32>, vector<16x128xf32> -> vector<16x128xf32>
    %c0_21 = arith.constant 0 : index
    %c0_22 = arith.constant 0 : index
    %24 = vector.load %arg9[%c0_21, %c0_22] : memref<1x128xf32, #tpu.memory_space<vmem>>, vector<1x128xf32>
    %25 = vector.broadcast %24 : vector<1x128xf32> to vector<16x128xf32>
    %26 = arith.addf %23, %25 : vector<16x128xf32>
    %c0_23 = arith.constant 0 : index
    %c0_24 = arith.constant 0 : index
    %27 = vector.load %arg10[%c0_23, %c0_24] : memref<16x128xf32, #tpu.memory_space<vmem>>, vector<16x128xf32>
    tpu.vector_store %arg10[%c0_23, %c0_24], %26 {strides = array<i32>} : memref<16x128xf32, #tpu.memory_space<vmem>>, vector<16x128xf32>,
    return
  }
  func.func @transform_0(%arg0: i32) -> (i32, i32) {
    %c0_i32 = arith.constant 0 : i32
    %c0_i32_0 = arith.constant 0 : i32
    return %arg0, %c0_i32 : i32, i32
  }
  func.func @transform_1(%arg0: i32) -> (i32, i32) {
    %c0_i32 = arith.constant 0 : i32
    %c0_i32_0 = arith.constant 0 : i32
    %c0_i32_1 = arith.constant 0 : i32
    return %c0_i32, %c0_i32_0 : i32, i32
  }
  func.func @transform_2(%arg0: i32) -> (i32, i32) {
    %c0_i32 = arith.constant 0 : i32
    %c0_i32_0 = arith.constant 0 : i32
    %c0_i32_1 = arith.constant 0 : i32
    return %c0_i32, %c0_i32_0 : i32, i32
  }
  func.func @transform_3(%arg0: i32) -> (i32, i32) {
    %c0_i32 = arith.constant 0 : i32
    %c0_i32_0 = arith.constant 0 : i32
    %c0_i32_1 = arith.constant 0 : i32
    return %c0_i32, %c0_i32_0 : i32, i32
  }
  func.func @transform_4(%arg0: i32) -> (i32, i32) {
    %c0_i32 = arith.constant 0 : i32
    %c0_i32_0 = arith.constant 0 : i32
    %c0_i32_1 = arith.constant 0 : i32
    return %c0_i32, %c0_i32_0 : i32, i32
  }
  func.func @transform_5(%arg0: i32) -> (i32, i32) {
    %c0_i32 = arith.constant 0 : i32
    %c0_i32_0 = arith.constant 0 : i32
    %c0_i32_1 = arith.constant 0 : i32
    return %c0_i32, %c0_i32_0 : i32, i32
  }
  func.func @transform_6(%arg0: i32) -> (i32, i32) {
    %c0_i32 = arith.constant 0 : i32
    %c0_i32_0 = arith.constant 0 : i32
    %c0_i32_1 = arith.constant 0 : i32
    return %c0_i32, %c0_i32_0 : i32, i32
  }
  func.func @transform_7(%arg0: i32) -> (i32, i32) {
    %c0_i32 = arith.constant 0 : i32
    %c0_i32_0 = arith.constant 0 : i32
    %c0_i32_1 = arith.constant 0 : i32
    return %c0_i32, %c0_i32_0 : i32, i32
  }
  func.func @transform_8(%arg0: i32) -> (i32, i32) {
    %c0_i32 = arith.constant 0 : i32
    %c0_i32_0 = arith.constant 0 : i32
    %c0_i32_1 = arith.constant 0 : i32
    return %c0_i32, %c0_i32_0 : i32, i32
  }
  func.func @transform_9(%arg0: i32) -> (i32, i32) {
    %c0_i32 = arith.constant 0 : i32
    %c0_i32_0 = arith.constant 0 : i32
    return %arg0, %c0_i32 : i32, i32
  }
}

</mosaic_0001>

<bundles_post_ra>
// kernel: _mlp_forward_impl.1
= control target key start
LH: loop header
LB: loop body
LE: loop exit
PB: predicated region body
PF: predicated region fallthrough
CT: control target
= control target key end

     0   :  { %14 = vsyncpa [#allocation3], 0  ;;  %s1094_s0 = inlined_call_operand.vmem [shape: f32[16,128], index: 0, kind: input, shape index: {}]   ;;  %s1095_s1 = inlined_call_operand.hbm [shape: f32[128,128], index: 1, kind: input, shape index: {}]   ;;  %s1096_s2 = inlined_call_operand.vmem [shape: f32[1,128], index: 2, kind: input, shape index: {}]   ;;  %s1097_s3 = inlined_call_operand.hbm [shape: f32[128,128], index: 3, kind: input, shape index: {}]   ;;  %s1098_s4 = inlined_call_operand.vmem [shape: f32[1,128], index: 4, kind: input, shape index: {}]   ;;  %s1099_s5 = inlined_call_operand.hbm [shape: f32[128,128], index: 5, kind: input, shape index: {}]   ;;  %s1100_s6 = inlined_call_operand.vmem [shape: f32[1,128], index: 6, kind: input, shape index: {}]   ;;  %s1101_s7 = inlined_call_operand.hbm [shape: f32[128,128], index: 7, kind: input, shape index: {}]   ;;  %s1102_s8 = inlined_call_operand.vmem [shape: f32[1,128], index: 8, kind: input, shape index: {}]   ;;  %s1103_s9 = inlined_call_operand.vmem [shape: f32[16,128], index: 9, kind: output, shape index: {}]  }
   0x1   :  { %15 = vsyncpa [#allocation5], 0 }
   0x2   :  { %16 = vsyncpa [#allocation8], 0  ;;  %s940_s30 = smov [#allocation4]   ;;  %s941_s11 = smov [#allocation2]  }
   0x3   :  { %s38_s10 = sshll.u32 %s940_s30, 4  ;;  %s24_s12 = sshll.u32 %s941_s11, 4  ;;  %s39_s10 = int_to_ptr.vmem [resolvable:$true] %s38_s10  ;;  %s996_s12 = int_to_ptr.vmem [resolvable:$true] %s24_s12 }
   0x4   :  { %s846_s15 = scalar_lea.hbm %s1097_s3, 2048 }
   0x5   :  { %p847_p0 = scmp.ne.s32.totalorder %s1097_s3, %s846_s15  ;;  %p850_p1 = scmp.lt.u32.totalorder %s846_s15, %s1097_s3 }
   0x7   :  { %p852_p2 = pnand %p850_p1, %p847_p0 }
   0x9   :  { %855 = shalt.err (!%p852_p2)
}
   0xa   :  { %s856_s20 = scalar_lea.vmem %s39_s10, 2048  ;;  %p861_p4 = scmp.lt.s32.totalorder %s39_s10, %s39_s10 }
   0xb   :  { %p857_p3 = scmp.ne.s32.totalorder %s39_s10, %s856_s20  ;;  %p862_p5 = scmp.lt.s32.totalorder %s856_s20, %s856_s20 }
   0xd   :  { %p863_p6 = por %p862_p5, %p861_p4 }
   0xf   :  { %p864_p7 = pnand %p863_p6, %p857_p3 }
  0x11   :  { %867 = shalt.err (!%p864_p7)
}
  0x12   :  { %s942_s21 = smov 128   ;;  %s943_s22 = smov 8  }
  0x13   :  { %44 = dma.hbm_to_vmem [thread:$0]  %s1097_s3, 2048, %s39_s10, [#allocation5], %s942_s21, %s942_s21, %s943_s22  }
  0x14   :  { %s868_s27 = scalar_lea.hbm %s1095_s1, 2048 }
  0x15   :  { %p869_p8 = scmp.ne.s32.totalorder %s1095_s1, %s868_s27  ;;  %p872_p9 = scmp.lt.u32.totalorder %s868_s27, %s1095_s1 }
  0x17   :  { %p874_p10 = pnand %p872_p9, %p869_p8 }
  0x19   :  { %877 = shalt.err (!%p874_p10)
}
  0x1a   :  { %s878_s13 = scalar_lea.vmem %s996_s12, 2048  ;;  %p883_p12 = scmp.lt.s32.totalorder %s996_s12, %s996_s12 }
  0x1b   :  { %p879_p11 = scmp.ne.s32.totalorder %s996_s12, %s878_s13  ;;  %p884_p13 = scmp.lt.s32.totalorder %s878_s13, %s878_s13 }
  0x1d   :  { %p885_p0 = por %p884_p13, %p883_p12 }
  0x1f   :  { %p886_p1 = pnand %p885_p0, %p879_p11 }
  0x21   :  { %889 = shalt.err (!%p886_p1)
}
  0x22   :  { %30 = dma.hbm_to_vmem [thread:$0]  %s1095_s1, 2048, %s996_s12, [#allocation3], %s942_s21, %s942_s21, %s943_s22  }
  0x23   :  { %s944_s14 = smov [#allocation6]   ;;  %s945_s16 = smov [#allocation7]  }
  0x24   :  { %s52_s15 = sshll.u32 %s944_s14, 4  ;;  %s66_s17 = sshll.u32 %s945_s16, 4  ;;  %s53_s15 = int_to_ptr.vmem [resolvable:$true] %s52_s15  ;;  %s1033_s17 = int_to_ptr.vmem [resolvable:$true] %s66_s17 }
  0x25   :  { %s890_s20 = scalar_lea.hbm %s1099_s5, 2048 }
  0x26   :  { %p891_p2 = scmp.ne.s32.totalorder %s1099_s5, %s890_s20  ;;  %p894_p3 = scmp.lt.u32.totalorder %s890_s20, %s1099_s5 }
  0x28   :  { %p896_p4 = pnand %p894_p3, %p891_p2 }
  0x2a   :  { %899 = shalt.err (!%p896_p4)
}
  0x2b   :  { %s900_s1 = scalar_lea.vmem %s53_s15, 2048  ;;  %p905_p6 = scmp.lt.s32.totalorder %s53_s15, %s53_s15 }
  0x2c   :  { %p901_p5 = scmp.ne.s32.totalorder %s53_s15, %s900_s1  ;;  %p906_p7 = scmp.lt.s32.totalorder %s900_s1, %s900_s1 }
  0x2e   :  { %p907_p8 = por %p906_p7, %p905_p6 }
  0x30   :  { %p908_p9 = pnand %p907_p8, %p901_p5 }
  0x32   :  { %911 = shalt.err (!%p908_p9)
}
  0x33   :  { %58 = dma.hbm_to_vmem [thread:$0]  %s1099_s5, 2048, %s53_s15, [#allocation5], %s942_s21, %s942_s21, %s943_s22  }
  0x34   :  { %s912_s30 = scalar_lea.hbm %s1101_s7, 2048 }
  0x35   :  { %p913_p10 = scmp.ne.s32.totalorder %s1101_s7, %s912_s30  ;;  %p916_p11 = scmp.lt.u32.totalorder %s912_s30, %s1101_s7 }
  0x37   :  { %p918_p12 = pnand %p916_p11, %p913_p10 }
  0x39   :  { %921 = shalt.err (!%p918_p12)
}
  0x3a   :  { %s922_s14 = scalar_lea.vmem %s1033_s17, 2048  ;;  %p927_p0 = scmp.lt.s32.totalorder %s1033_s17, %s1033_s17 }
  0x3b   :  { %p923_p13 = scmp.ne.s32.totalorder %s1033_s17, %s922_s14  ;;  %p928_p1 = scmp.lt.s32.totalorder %s922_s14, %s922_s14 }
  0x3d   :  { %p929_p2 = por %p928_p1, %p927_p0 }
  0x3f   :  { %p930_p3 = pnand %p929_p2, %p923_p13 }
  0x41   :  { %933 = shalt.err (!%p930_p3)
}
  0x42   :  { %72 = dma.hbm_to_vmem [thread:$0]  %s1101_s7, 2048, %s1033_s17, [#allocation8], %s942_s21, %s942_s21, %s943_s22  }
  0x43   :  { %934 = dma.done.wait [#allocation3], 2048  }
  0x44   :  { %935 = vsyncadd [#allocation3], 4294965248 }
  0x45   :  { %936 = dma.done.wait [#allocation5], 4096  }
  0x46   :  { %937 = vsyncadd [#allocation5], 4294963200 }
  0x47   :  { %938 = dma.done.wait [#allocation8], 2048  }
  0x48   :  { %939 = vsyncadd [#allocation8], 4294965248  ;;  %v89_v0 = vld [vmem:[#allocation2] sm:$0xff]  ;;  %v90_v1 = vld [vmem:[#allocation2 + $0x8] sm:$0xff] }
  0x49   :  { %v91_v2 = vld [vmem:[#allocation2 + $0x10] sm:$0xff]  ;;  %v712_v3 = vpack.c.bf16 %v90_v1, %v89_v0  ;;  %v92_v4 = vld [vmem:[#allocation2 + $0x18] sm:$0xff]  ;;  %v93_v6 = vld [vmem:[#allocation2 + $0x20] sm:$0xff] }
  0x4a   :  { %v716_v5 = vpack.c.bf16 %v92_v4, %v91_v2  ;;  %v94_v7 = vld [vmem:[#allocation2 + $0x28] sm:$0xff]  ;;  %v95_v9 = vld [vmem:[#allocation2 + $0x30] sm:$0xff]  ;;  %v96_v10 = vld [vmem:[#allocation2 + $0x38] sm:$0xff] }
  0x4b   :  { %713 = vmatprep.subr.bf16.mxu0 %v712_v3  ;;  %v720_v8 = vpack.c.bf16 %v94_v7, %v93_v6  ;;  %v87_v11 = vld [vmem:[%s1094_s0] sm:$0xff]  ;;  %v190_v13 = vld [vmem:[#allocation4 + $0x8] sm:$0xff]  ;;  %v191_v14 = vld [vmem:[#allocation4 + $0x10] sm:$0xff]  ;;  %v724_v20 = vpack.c.bf16 %v96_v10, %v95_v9 }
  0x4c   :  { %715 = vmatpush3.bf16.msra.mxu0 %v712_v3  ;;  %604 = vmatprep.mubr.f32.mxu0 %v87_v11  ;;  %v189_v12 = vld [vmem:[#allocation4] sm:$0xff]  ;;  %v192_v16 = vld [vmem:[#allocation4 + $0x18] sm:$0xff]  ;;  %v194_v19 = vld [vmem:[#allocation4 + $0x28] sm:$0xff] }
  0x4d   :  { %717 = vmatprep.subr.bf16.mxu0 %v716_v5  ;;  %v744_v15 = vpack.c.bf16 %v190_v13, %v189_v12  ;;  %v748_v17 = vpack.c.bf16 %v192_v16, %v191_v14  ;;  %v193_v18 = vld [vmem:[#allocation4 + $0x20] sm:$0xff]  ;;  %v98_v22 = vld [vmem:[#allocation2 + $0x48] sm:$0xff]  ;;  %v195_v24 = vld [vmem:[#allocation4 + $0x30] sm:$0xff] }
  0x4e   :  { %v97_v21 = vld [vmem:[#allocation2 + $0x40] sm:$0xff]  ;;  %v752_v23 = vpack.c.bf16 %v194_v19, %v193_v18  ;;  %v196_v25 = vld [vmem:[#allocation4 + $0x38] sm:$0xff]  ;;  %v99_v27 = vld [vmem:[#allocation2 + $0x50] sm:$0xff] }
  0x4f   :  { %745 = vmatprep.subr.bf16.mxu1 %v744_v15  ;;  %v728_v26 = vpack.c.bf16 %v98_v22, %v97_v21  ;;  %v100_v28 = vld [vmem:[#allocation2 + $0x58] sm:$0xff]  ;;  %v756_v29 = vpack.c.bf16 %v196_v25, %v195_v24  ;;  %v197_v30 = vld [vmem:[#allocation4 + $0x40] sm:$0xff]  ;;  %v198_v31 = vld [vmem:[#allocation4 + $0x48] sm:$0xff] }
  0x50   :  { %719 = vmatpush3.bf16.msra.mxu0 %v716_v5  ;;  %747 = vmatpush3.bf16.msra.mxu1 %v744_v15  ;;  %v732_v32 = vpack.c.bf16 %v100_v28, %v99_v27  ;;  %v101_v33 = vld [vmem:[#allocation2 + $0x60] sm:$0xff]  ;;  %v102_v34 = vld [vmem:[#allocation2 + $0x68] sm:$0xff]  ;;  %v760_v35 = vpack.c.bf16 %v198_v31, %v197_v30  ;;  %v199_v36 = vld [vmem:[#allocation4 + $0x50] sm:$0xff] }
  0x51   :  { %721 = vmatprep.subr.bf16.mxu0 %v720_v8  ;;  %749 = vmatprep.subr.bf16.mxu1 %v748_v17  ;;  %v200_v37 = vld [vmem:[#allocation4 + $0x58] sm:$0xff]  ;;  %v736_v38 = vpack.c.bf16 %v102_v34, %v101_v33  ;;  %v103_v39 = vld [vmem:[#allocation2 + $0x70] sm:$0xff]  ;;  %v201_v42 = vld [vmem:[#allocation4 + $0x60] sm:$0xff] }
  0x52   :  { %v104_v40 = vld [vmem:[#allocation2 + $0x78] sm:$0xff]  ;;  %v764_v41 = vpack.c.bf16 %v200_v37, %v199_v36  ;;  %v202_v43 = vld [vmem:[#allocation4 + $0x68] sm:$0xff]  ;;  %v203_v47 = vld [vmem:[#allocation4 + $0x70] sm:$0xff] }
  0x53   :  { %v740_v44 = vpack.c.bf16 %v104_v40, %v103_v39  ;;  %v768_v45 = vpack.c.bf16 %v202_v43, %v201_v42  ;;  %v88_v46 = vld [vmem:[%s1094_s0 + $0x8] sm:$0xff]  ;;  %v204_v48 = vld [vmem:[#allocation4 + $0x78] sm:$0xff]  ;;  %v289_v50 = vld [vmem:[#allocation6] sm:$0xff] }
  0x54   :  { %723 = vmatpush3.bf16.msra.mxu0 %v720_v8  ;;  %751 = vmatpush3.bf16.msra.mxu1 %v748_v17  ;;  %v772_v49 = vpack.c.bf16 %v204_v48, %v203_v47  ;;  %v290_v51 = vld [vmem:[#allocation6 + $0x8] sm:$0xff]  ;;  %v291_v52 = vld [vmem:[#allocation6 + $0x10] sm:$0xff]  ;;  %v292_v54 = vld [vmem:[#allocation6 + $0x18] sm:$0xff] }
  0x55   :  { %725 = vmatprep.subr.bf16.mxu0 %v724_v20  ;;  %753 = vmatprep.subr.bf16.mxu1 %v752_v23  ;;  %v776_v53 = vpack.c.bf16 %v290_v51, %v289_v50  ;;  %v780_v55 = vpack.c.bf16 %v292_v54, %v291_v52  ;;  %v293_v56 = vld [vmem:[#allocation6 + $0x20] sm:$0xff]  ;;  %v294_v57 = vld [vmem:[#allocation6 + $0x28] sm:$0xff]  ;;  %v295_v59 = vld [vmem:[#allocation6 + $0x30] sm:$0xff] }
  0x56   :  { %v784_v58 = vpack.c.bf16 %v294_v57, %v293_v56  ;;  %v296_v60 = vld [vmem:[#allocation6 + $0x38] sm:$0xff]  ;;  %v297_v62 = vld [vmem:[#allocation6 + $0x40] sm:$0xff]  ;;  %v298_v63 = vld [vmem:[#allocation6 + $0x48] sm:$0xff] }
  0x57   :  { %v788_v61 = vpack.c.bf16 %v296_v60, %v295_v59  ;;  %v792_v0 = vpack.c.bf16 %v298_v63, %v297_v62  ;;  %v299_v1 = vld [vmem:[#allocation6 + $0x50] sm:$0xff]  ;;  %v300_v2 = vld [vmem:[#allocation6 + $0x58] sm:$0xff]  ;;  %v301_v4 = vld [vmem:[#allocation6 + $0x60] sm:$0xff] }
  0x58   :  { %727 = vmatpush3.bf16.msra.mxu0 %v724_v20  ;;  %755 = vmatpush3.bf16.msra.mxu1 %v752_v23  ;;  %v796_v3 = vpack.c.bf16 %v300_v2, %v299_v1  ;;  %v302_v5 = vld [vmem:[#allocation6 + $0x68] sm:$0xff]  ;;  %v496_v7 = vld [vmem:[%s1096_s2] ss:$0 sm:$0xff]  ;;  %v303_v14 = vld [vmem:[#allocation6 + $0x70] sm:$0xff] }
  0x59   :  { %729 = vmatprep.subr.bf16.mxu0 %v728_v26  ;;  %757 = vmatprep.subr.bf16.mxu1 %v756_v29  ;;  %v800_v6 = vpack.c.bf16 %v302_v5, %v301_v4  ;;  %v304_v15 = vld [vmem:[#allocation6 + $0x78] sm:$0xff]  ;;  %v389_v17 = vld [vmem:[#allocation7] sm:$0xff]  ;;  %v390_v18 = vld [vmem:[#allocation7 + $0x8] sm:$0xff] }
  0x5a   :  { %v804_v16 = vpack.c.bf16 %v304_v15, %v303_v14  ;;  %v391_v19 = vld [vmem:[#allocation7 + $0x10] sm:$0xff]  ;;  %v808_v20 = vpack.c.bf16 %v390_v18, %v389_v17  ;;  %v392_v21 = vld [vmem:[#allocation7 + $0x18] sm:$0xff]  ;;  %v393_v23 = vld [vmem:[#allocation7 + $0x20] sm:$0xff] }
  0x5b   :  { %v812_v22 = vpack.c.bf16 %v392_v21, %v391_v19  ;;  %v394_v24 = vld [vmem:[#allocation7 + $0x28] sm:$0xff]  ;;  %v396_v27 = vld [vmem:[#allocation7 + $0x38] sm:$0xff]  ;;  %v498_v48 = vld [vmem:[%s1100_s6] ss:$0 sm:$0xff] }
  0x5c   :  { %731 = vmatpush3.bf16.msra.mxu0 %v728_v26  ;;  %759 = vmatpush3.bf16.msra.mxu1 %v756_v29  ;;  %v816_v25 = vpack.c.bf16 %v394_v24, %v393_v23  ;;  %v395_v26 = vld [vmem:[#allocation7 + $0x30] sm:$0xff]  ;;  %v397_v29 = vld [vmem:[#allocation7 + $0x40] sm:$0xff]  ;;  %v398_v30 = vld [vmem:[#allocation7 + $0x48] sm:$0xff] }
  0x5d   :  { %733 = vmatprep.subr.bf16.mxu0 %v732_v32  ;;  %761 = vmatprep.subr.bf16.mxu1 %v760_v35  ;;  %v820_v28 = vpack.c.bf16 %v396_v27, %v395_v26  ;;  %v824_v31 = vpack.c.bf16 %v398_v30, %v397_v29  ;;  %v400_v33 = vld [vmem:[#allocation7 + $0x58] sm:$0xff]  ;;  %v402_v36 = vld [vmem:[#allocation7 + $0x68] sm:$0xff] }
  0x60   :  { %735 = vmatpush3.bf16.msra.mxu0 %v732_v32  ;;  %763 = vmatpush3.bf16.msra.mxu1 %v760_v35  ;;  %v399_v32 = vld [vmem:[#allocation7 + $0x50] sm:$0xff]  ;;  %v401_v35 = vld [vmem:[#allocation7 + $0x60] sm:$0xff] }
  0x61   :  { %737 = vmatprep.subr.bf16.mxu0 %v736_v38  ;;  %765 = vmatprep.subr.bf16.mxu1 %v764_v41  ;;  %v828_v34 = vpack.c.bf16 %v400_v33, %v399_v32  ;;  %v832_v37 = vpack.c.bf16 %v402_v36, %v401_v35 }
  0x64   :  { %739 = vmatpush3.bf16.msra.mxu0 %v736_v38  ;;  %767 = vmatpush3.bf16.msra.mxu1 %v764_v41  ;;  %v497_v38 = vld [vmem:[%s1098_s4] ss:$0 sm:$0xff] }
  0x65   :  { %741 = vmatprep.subr.bf16.mxu0 %v740_v44  ;;  %769 = vmatprep.subr.bf16.mxu1 %v768_v45 }
  0x68   :  { %743 = vmatpush3.bf16.msra.mxu0 %v740_v44  ;;  %771 = vmatpush3.bf16.msra.mxu1 %v768_v45  ;;  %v403_v45 = vld [vmem:[#allocation7 + $0x70] sm:$0xff] }
  0x69   :  { %773 = vmatprep.subr.bf16.mxu1 %v772_v49  ;;  %777 = vmatprep.subr.bf16.mxu0 %v776_v53 }
  0x6b   :  { %605 = vmatmul.mubr.f32.vlgmr.msra.gmra.mrb[0].mxu0 %v88_v46  ;;  %v404_v46 = vld [vmem:[#allocation7 + $0x78] sm:$0xff] }
  0x6c   :  { %775 = vmatpush3.bf16.msra.mxu1 %v772_v49  ;;  %779 = vmatpush3.bf16.msra.mxu0 %v776_v53  ;;  %v836_v47 = vpack.c.bf16 %v404_v46, %v403_v45 }
  0x6d   :  { %781 = vmatprep.subr.bf16.mxu0 %v780_v55  ;;  %809 = vmatprep.subr.bf16.mxu1 %v808_v20 }
  0x70   :  { %783 = vmatpush3.bf16.msra.mxu0 %v780_v55  ;;  %v499_v55 = vld [vmem:[%s1102_s8] ss:$0 sm:$0xff] }
  0x71   :  { %785 = vmatprep.subr.bf16.mxu0 %v784_v58 }
  0x74   :  { %787 = vmatpush3.bf16.msra.mxu0 %v784_v58 }
  0x75   :  { %789 = vmatprep.subr.bf16.mxu0 %v788_v61 }
  0x78   :  { %791 = vmatpush3.bf16.msra.mxu0 %v788_v61 }
  0x79   :  { %793 = vmatprep.subr.bf16.mxu0 %v792_v0 }
  0x7c   :  { %795 = vmatpush3.bf16.msra.mxu0 %v792_v0 }
  0x7d   :  { %797 = vmatprep.subr.bf16.mxu0 %v796_v3 }
  0x80   :  { %799 = vmatpush3.bf16.msra.mxu0 %v796_v3 }
  0x81   :  { %801 = vmatprep.subr.bf16.mxu0 %v800_v6 }
  0x84   :  { %803 = vmatpush3.bf16.msra.mxu0 %v800_v6 }
  0x85   :  { %805 = vmatprep.subr.bf16.mxu0 %v804_v16 }
  0x88   :  { %807 = vmatpush3.bf16.msra.mxu0 %v804_v16 }
 0x13e   :  { %v606_v8 = vpop.f32.mrb[0].mxu0 }
 0x13f   :  { %v184_v9 = vadd.f32 %v606_v8, %v496_v7  ;;  %v178_v10 = vpop.f32.mrb[1].mxu0 }
 0x140   :  { %v179_v11 = vadd.f32 %v496_v7, %v178_v10 }
 0x141   :  { %v188_v13 = vmax.f32 %v184_v9, 0.0 }
 0x142   :  { %v187_v12 = vmax.f32 %v179_v11, 0.0 }
 0x144   :  { %639 = vmatprep.mubr.f32.mxu1 %v187_v12 }
 0x145   :  { %640 = vmatmul.mubr.f32.vlgmr.msra.gmra.mrb[0].mxu1 %v188_v13 }
 0x146   :  { %811 = vmatpush3.bf16.msra.mxu1 %v808_v20 }
 0x147   :  { %813 = vmatprep.subr.bf16.mxu1 %v812_v22 }
 0x14a   :  { %815 = vmatpush3.bf16.msra.mxu1 %v812_v22 }
 0x14b   :  { %817 = vmatprep.subr.bf16.mxu1 %v816_v25 }
 0x14e   :  { %819 = vmatpush3.bf16.msra.mxu1 %v816_v25 }
 0x14f   :  { %821 = vmatprep.subr.bf16.mxu1 %v820_v28 }
 0x152   :  { %823 = vmatpush3.bf16.msra.mxu1 %v820_v28 }
 0x153   :  { %825 = vmatprep.subr.bf16.mxu1 %v824_v31 }
 0x156   :  { %827 = vmatpush3.bf16.msra.mxu1 %v824_v31 }
 0x157   :  { %829 = vmatprep.subr.bf16.mxu1 %v828_v34 }
 0x15a   :  { %831 = vmatpush3.bf16.msra.mxu1 %v828_v34 }
 0x15b   :  { %833 = vmatprep.subr.bf16.mxu1 %v832_v37 }
 0x15e   :  { %835 = vmatpush3.bf16.msra.mxu1 %v832_v37 }
 0x15f   :  { %837 = vmatprep.subr.bf16.mxu1 %v836_v47 }
 0x162   :  { %839 = vmatpush3.bf16.msra.mxu1 %v836_v47 }
 0x218   :  { %v641_v39 = vpop.f32.mrb[0].mxu1 }
 0x219   :  { %v284_v40 = vadd.f32 %v641_v39, %v497_v38  ;;  %v278_v41 = vpop.f32.mrb[1].mxu1 }
 0x21a   :  { %v279_v42 = vadd.f32 %v497_v38, %v278_v41 }
 0x21b   :  { %v288_v44 = vmax.f32 %v284_v40, 0.0 }
 0x21c   :  { %v287_v43 = vmax.f32 %v279_v42, 0.0 }
 0x21e   :  { %674 = vmatprep.mubr.f32.mxu0 %v287_v43 }
 0x21f   :  { %675 = vmatmul.mubr.f32.vlgmr.msra.gmra.mrb[2].mxu0 %v288_v44 }
 0x2f2   :  { %v676_v49 = vpop.f32.mrb[2].mxu0 }
 0x2f3   :  { %v384_v50 = vadd.f32 %v676_v49, %v498_v48  ;;  %v378_v51 = vpop.f32.mrb[3].mxu0 }
 0x2f4   :  { %v379_v52 = vadd.f32 %v498_v48, %v378_v51 }
 0x2f5   :  { %v388_v54 = vmax.f32 %v384_v50, 0.0 }
 0x2f6   :  { %v387_v53 = vmax.f32 %v379_v52, 0.0 }
 0x2f8   :  { %709 = vmatprep.mubr.f32.mxu1 %v387_v53 }
 0x2f9   :  { %710 = vmatmul.mubr.f32.vlgmr.msra.gmra.mrb[2].mxu1 %v388_v54 }
 0x3cc   :  { %v711_v56 = vpop.f32.mrb[2].mxu1 }
 0x3cd   :  { %v484_v57 = vadd.f32 %v711_v56, %v499_v55  ;;  %v478_v58 = vpop.f32.mrb[3].mxu1 }
 0x3ce   :  { %v479_v59 = vadd.f32 %v499_v55, %v478_v58 }
 0x3cf   :  { %488 = vst [vmem:[%s1103_s9 + $0x8] sm:$0xff] %v484_v57 }
 0x3d0   :  { %487 = vst [vmem:[%s1103_s9] sm:$0xff] %v479_v59 }
 0x3d1   :  { %493 = vsyncpa [#allocation3], 1 }
 0x3d2   :  { %494 = vsyncpa [#allocation5], 1 }
 0x3d3   :  { %495 = vsyncpa [#allocation8], 1 }

// kernel: _mlp_forward_impl.1
= control target key start
LH: loop header
LB: loop body
LE: loop exit
PB: predicated region body
PF: predicated region fallthrough
CT: control target
= control target key end

     0   :  { %14 = vsyncpa [#allocation3], 0  ;;  %s1094_s0 = inlined_call_operand.vmem [shape: f32[16,128], index: 0, kind: input, shape index: {}]   ;;  %s1095_s1 = inlined_call_operand.hbm [shape: f32[128,128], index: 1, kind: input, shape index: {}]   ;;  %s1096_s2 = inlined_call_operand.vmem [shape: f32[1,128], index: 2, kind: input, shape index: {}]   ;;  %s1097_s3 = inlined_call_operand.hbm [shape: f32[128,128], index: 3, kind: input, shape index: {}]   ;;  %s1098_s4 = inlined_call_operand.vmem [shape: f32[1,128], index: 4, kind: input, shape index: {}]   ;;  %s1099_s5 = inlined_call_operand.hbm [shape: f32[128,128], index: 5, kind: input, shape index: {}]   ;;  %s1100_s6 = inlined_call_operand.vmem [shape: f32[1,128], index: 6, kind: input, shape index: {}]   ;;  %s1101_s7 = inlined_call_operand.hbm [shape: f32[128,128], index: 7, kind: input, shape index: {}]   ;;  %s1102_s8 = inlined_call_operand.vmem [shape: f32[1,128], index: 8, kind: input, shape index: {}]   ;;  %s1103_s9 = inlined_call_operand.vmem [shape: f32[16,128], index: 9, kind: output, shape index: {}]  }
   0x1   :  { %15 = vsyncpa [#allocation5], 0 }
   0x2   :  { %16 = vsyncpa [#allocation8], 0  ;;  %s940_s30 = smov [#allocation4]   ;;  %s941_s11 = smov [#allocation2]  }
   0x3   :  { %s38_s10 = sshll.u32 %s940_s30, 4  ;;  %s24_s12 = sshll.u32 %s941_s11, 4  ;;  %s39_s10 = int_to_ptr.vmem [resolvable:$true] %s38_s10  ;;  %s996_s12 = int_to_ptr.vmem [resolvable:$true] %s24_s12 }
   0x4   :  { %s846_s15 = scalar_lea.hbm %s1097_s3, 2048 }
   0x5   :  { %p847_p0 = scmp.ne.s32.totalorder %s1097_s3, %s846_s15  ;;  %p850_p1 = scmp.lt.u32.totalorder %s846_s15, %s1097_s3 }
   0x7   :  { %p852_p2 = pnand %p850_p1, %p847_p0 }
   0x9   :  { %855 = shalt.err (!%p852_p2)
}
   0xa   :  { %s856_s20 = scalar_lea.vmem %s39_s10, 2048  ;;  %p861_p4 = scmp.lt.s32.totalorder %s39_s10, %s39_s10 }
   0xb   :  { %p857_p3 = scmp.ne.s32.totalorder %s39_s10, %s856_s20  ;;  %p862_p5 = scmp.lt.s32.totalorder %s856_s20, %s856_s20 }
   0xd   :  { %p863_p6 = por %p862_p5, %p861_p4 }
   0xf   :  { %p864_p7 = pnand %p863_p6, %p857_p3 }
  0x11   :  { %867 = shalt.err (!%p864_p7)
}
  0x12   :  { %s942_s21 = smov 128   ;;  %s943_s22 = smov 8  }
  0x13   :  { %44 = dma.hbm_to_vmem [thread:$0]  %s1097_s3, 2048, %s39_s10, [#allocation5], %s942_s21, %s942_s21, %s943_s22  }
  0x14   :  { %s868_s27 = scalar_lea.hbm %s1095_s1, 2048 }
  0x15   :  { %p869_p8 = scmp.ne.s32.totalorder %s1095_s1, %s868_s27  ;;  %p872_p9 = scmp.lt.u32.totalorder %s868_s27, %s1095_s1 }
  0x17   :  { %p874_p10 = pnand %p872_p9, %p869_p8 }
  0x19   :  { %877 = shalt.err (!%p874_p10)
}
  0x1a   :  { %s878_s13 = scalar_lea.vmem %s996_s12, 2048  ;;  %p883_p12 = scmp.lt.s32.totalorder %s996_s12, %s996_s12 }
  0x1b   :  { %p879_p11 = scmp.ne.s32.totalorder %s996_s12, %s878_s13  ;;  %p884_p13 = scmp.lt.s32.totalorder %s878_s13, %s878_s13 }
  0x1d   :  { %p885_p0 = por %p884_p13, %p883_p12 }
  0x1f   :  { %p886_p1 = pnand %p885_p0, %p879_p11 }
  0x21   :  { %889 = shalt.err (!%p886_p1)
}
  0x22   :  { %30 = dma.hbm_to_vmem [thread:$0]  %s1095_s1, 2048, %s996_s12, [#allocation3], %s942_s21, %s942_s21, %s943_s22  }
  0x23   :  { %s944_s14 = smov [#allocation6]   ;;  %s945_s16 = smov [#allocation7]  }
  0x24   :  { %s52_s15 = sshll.u32 %s944_s14, 4  ;;  %s66_s17 = sshll.u32 %s945_s16, 4  ;;  %s53_s15 = int_to_ptr.vmem [resolvable:$true] %s52_s15  ;;  %s1033_s17 = int_to_ptr.vmem [resolvable:$true] %s66_s17 }
  0x25   :  { %s890_s20 = scalar_lea.hbm %s1099_s5, 2048 }
  0x26   :  { %p891_p2 = scmp.ne.s32.totalorder %s1099_s5, %s890_s20  ;;  %p894_p3 = scmp.lt.u32.totalorder %s890_s20, %s1099_s5 }
  0x28   :  { %p896_p4 = pnand %p894_p3, %p891_p2 }
  0x2a   :  { %899 = shalt.err (!%p896_p4)
}
  0x2b   :  { %s900_s1 = scalar_lea.vmem %s53_s15, 2048  ;;  %p905_p6 = scmp.lt.s32.totalorder %s53_s15, %s53_s15 }
  0x2c   :  { %p901_p5 = scmp.ne.s32.totalorder %s53_s15, %s900_s1  ;;  %p906_p7 = scmp.lt.s32.totalorder %s900_s1, %s900_s1 }
  0x2e   :  { %p907_p8 = por %p906_p7, %p905_p6 }
  0x30   :  { %p908_p9 = pnand %p907_p8, %p901_p5 }
  0x32   :  { %911 = shalt.err (!%p908_p9)
}
  0x33   :  { %58 = dma.hbm_to_vmem [thread:$0]  %s1099_s5, 2048, %s53_s15, [#allocation5], %s942_s21, %s942_s21, %s943_s22  }
  0x34   :  { %s912_s30 = scalar_lea.hbm %s1101_s7, 2048 }
  0x35   :  { %p913_p10 = scmp.ne.s32.totalorder %s1101_s7, %s912_s30  ;;  %p916_p11 = scmp.lt.u32.totalorder %s912_s30, %s1101_s7 }
  0x37   :  { %p918_p12 = pnand %p916_p11, %p913_p10 }
  0x39   :  { %921 = shalt.err (!%p918_p12)
}
  0x3a   :  { %s922_s14 = scalar_lea.vmem %s1033_s17, 2048  ;;  %p927_p0 = scmp.lt.s32.totalorder %s1033_s17, %s1033_s17 }
  0x3b   :  { %p923_p13 = scmp.ne.s32.totalorder %s1033_s17, %s922_s14  ;;  %p928_p1 = scmp.lt.s32.totalorder %s922_s14, %s922_s14 }
  0x3d   :  { %p929_p2 = por %p928_p1, %p927_p0 }
  0x3f   :  { %p930_p3 = pnand %p929_p2, %p923_p13 }
  0x41   :  { %933 = shalt.err (!%p930_p3)
}
  0x42   :  { %72 = dma.hbm_to_vmem [thread:$0]  %s1101_s7, 2048, %s1033_s17, [#allocation8], %s942_s21, %s942_s21, %s943_s22  }
  0x43   :  { %934 = dma.done.wait [#allocation3], 2048  }
  0x44   :  { %935 = vsyncadd [#allocation3], 4294965248 }
  0x45   :  { %936 = dma.done.wait [#allocation5], 4096  }
  0x46   :  { %937 = vsyncadd [#allocation5], 4294963200 }
  0x47   :  { %938 = dma.done.wait [#allocation8], 2048  }
  0x48   :  { %939 = vsyncadd [#allocation8], 4294965248  ;;  %v89_v0 = vld [vmem:[#allocation2] sm:$0xff]  ;;  %v90_v1 = vld [vmem:[#allocation2 + $0x8] sm:$0xff] }
  0x49   :  { %v91_v2 = vld [vmem:[#allocation2 + $0x10] sm:$0xff]  ;;  %v712_v3 = vpack.c.bf16 %v90_v1, %v89_v0  ;;  %v92_v4 = vld [vmem:[#allocation2 + $0x18] sm:$0xff]  ;;  %v93_v6 = vld [vmem:[#allocation2 + $0x20] sm:$0xff] }
  0x4a   :  { %v716_v5 = vpack.c.bf16 %v92_v4, %v91_v2  ;;  %v94_v7 = vld [vmem:[#allocation2 + $0x28] sm:$0xff]  ;;  %v95_v9 = vld [vmem:[#allocation2 + $0x30] sm:$0xff]  ;;  %v96_v10 = vld [vmem:[#allocation2 + $0x38] sm:$0xff] }
  0x4b   :  { %713 = vmatprep.subr.bf16.mxu0 %v712_v3  ;;  %v720_v8 = vpack.c.bf16 %v94_v7, %v93_v6  ;;  %v87_v11 = vld [vmem:[%s1094_s0] sm:$0xff]  ;;  %v190_v13 = vld [vmem:[#allocation4 + $0x8] sm:$0xff]  ;;  %v191_v14 = vld [vmem:[#allocation4 + $0x10] sm:$0xff]  ;;  %v724_v20 = vpack.c.bf16 %v96_v10, %v95_v9 }
  0x4c   :  { %715 = vmatpush3.bf16.msra.mxu0 %v712_v3  ;;  %604 = vmatprep.mubr.f32.mxu0 %v87_v11  ;;  %v189_v12 = vld [vmem:[#allocation4] sm:$0xff]  ;;  %v192_v16 = vld [vmem:[#allocation4 + $0x18] sm:$0xff]  ;;  %v194_v19 = vld [vmem:[#allocation4 + $0x28] sm:$0xff] }
  0x4d   :  { %717 = vmatprep.subr.bf16.mxu0 %v716_v5  ;;  %v744_v15 = vpack.c.bf16 %v190_v13, %v189_v12  ;;  %v748_v17 = vpack.c.bf16 %v192_v16, %v191_v14  ;;  %v193_v18 = vld [vmem:[#allocation4 + $0x20] sm:$0xff]  ;;  %v98_v22 = vld [vmem:[#allocation2 + $0x48] sm:$0xff]  ;;  %v195_v24 = vld [vmem:[#allocation4 + $0x30] sm:$0xff] }
  0x4e   :  { %v97_v21 = vld [vmem:[#allocation2 + $0x40] sm:$0xff]  ;;  %v752_v23 = vpack.c.bf16 %v194_v19, %v193_v18  ;;  %v196_v25 = vld [vmem:[#allocation4 + $0x38] sm:$0xff]  ;;  %v99_v27 = vld [vmem:[#allocation2 + $0x50] sm:$0xff] }
  0x4f   :  { %745 = vmatprep.subr.bf16.mxu1 %v744_v15  ;;  %v728_v26 = vpack.c.bf16 %v98_v22, %v97_v21  ;;  %v100_v28 = vld [vmem:[#allocation2 + $0x58] sm:$0xff]  ;;  %v756_v29 = vpack.c.bf16 %v196_v25, %v195_v24  ;;  %v197_v30 = vld [vmem:[#allocation4 + $0x40] sm:$0xff]  ;;  %v198_v31 = vld [vmem:[#allocation4 + $0x48] sm:$0xff] }
  0x50   :  { %719 = vmatpush3.bf16.msra.mxu0 %v716_v5  ;;  %747 = vmatpush3.bf16.msra.mxu1 %v744_v15  ;;  %v732_v32 = vpack.c.bf16 %v100_v28, %v99_v27  ;;  %v101_v33 = vld [vmem:[#allocation2 + $0x60] sm:$0xff]  ;;  %v102_v34 = vld [vmem:[#allocation2 + $0x68] sm:$0xff]  ;;  %v760_v35 = vpack.c.bf16 %v198_v31, %v197_v30  ;;  %v199_v36 = vld [vmem:[#allocation4 + $0x50] sm:$0xff] }
  0x51   :  { %721 = vmatprep.subr.bf16.mxu0 %v720_v8  ;;  %749 = vmatprep.subr.bf16.mxu1 %v748_v17  ;;  %v200_v37 = vld [vmem:[#allocation4 + $0x58] sm:$0xff]  ;;  %v736_v38 = vpack.c.bf16 %v102_v34, %v101_v33  ;;  %v103_v39 = vld [vmem:[#allocation2 + $0x70] sm:$0xff]  ;;  %v201_v42 = vld [vmem:[#allocation4 + $0x60] sm:$0xff] }
  0x52   :  { %v104_v40 = vld [vmem:[#allocation2 + $0x78] sm:$0xff]  ;;  %v764_v41 = vpack.c.bf16 %v200_v37, %v199_v36  ;;  %v202_v43 = vld [vmem:[#allocation4 + $0x68] sm:$0xff]  ;;  %v203_v47 = vld [vmem:[#allocation4 + $0x70] sm:$0xff] }
  0x53   :  { %v740_v44 = vpack.c.bf16 %v104_v40, %v103_v39  ;;  %v768_v45 = vpack.c.bf16 %v202_v43, %v201_v42  ;;  %v88_v46 = vld [vmem:[%s1094_s0 + $0x8] sm:$0xff]  ;;  %v204_v48 = vld [vmem:[#allocation4 + $0x78] sm:$0xff]  ;;  %v289_v50 = vld [vmem:[#allocation6] sm:$0xff] }
  0x54   :  { %723 = vmatpush3.bf16.msra.mxu0 %v720_v8  ;;  %751 = vmatpush3.bf16.msra.mxu1 %v748_v17  ;;  %v772_v49 = vpack.c.bf16 %v204_v48, %v203_v47  ;;  %v290_v51 = vld [vmem:[#allocation6 + $0x8] sm:$0xff]  ;;  %v291_v52 = vld [vmem:[#allocation6 + $0x10] sm:$0xff]  ;;  %v292_v54 = vld [vmem:[#allocation6 + $0x18] sm:$0xff] }
  0x55   :  { %725 = vmatprep.subr.bf16.mxu0 %v724_v20  ;;  %753 = vmatprep.subr.bf16.mxu1 %v752_v23  ;;  %v776_v53 = vpack.c.bf16 %v290_v51, %v289_v50  ;;  %v780_v55 = vpack.c.bf16 %v292_v54, %v291_v52  ;;  %v293_v56 = vld [vmem:[#allocation6 + $0x20] sm:$0xff]  ;;  %v294_v57 = vld [vmem:[#allocation6 + $0x28] sm:$0xff]  ;;  %v295_v59 = vld [vmem:[#allocation6 + $0x30] sm:$0xff] }
  0x56   :  { %v784_v58 = vpack.c.bf16 %v294_v57, %v293_v56  ;;  %v296_v60 = vld [vmem:[#allocation6 + $0x38] sm:$0xff]  ;;  %v297_v62 = vld [vmem:[#allocation6 + $0x40] sm:$0xff]  ;;  %v298_v63 = vld [vmem:[#allocation6 + $0x48] sm:$0xff] }
  0x57   :  { %v788_v61 = vpack.c.bf16 %v296_v60, %v295_v59  ;;  %v792_v0 = vpack.c.bf16 %v298_v63, %v297_v62  ;;  %v299_v1 = vld [vmem:[#allocation6 + $0x50] sm:$0xff]  ;;  %v300_v2 = vld [vmem:[#allocation6 + $0x58] sm:$0xff]  ;;  %v301_v4 = vld [vmem:[#allocation6 + $0x60] sm:$0xff] }
  0x58   :  { %727 = vmatpush3.bf16.msra.mxu0 %v724_v20  ;;  %755 = vmatpush3.bf16.msra.mxu1 %v752_v23  ;;  %v796_v3 = vpack.c.bf16 %v300_v2, %v299_v1  ;;  %v302_v5 = vld [vmem:[#allocation6 + $0x68] sm:$0xff]  ;;  %v496_v7 = vld [vmem:[%s1096_s2] ss:$0 sm:$0xff]  ;;  %v303_v14 = vld [vmem:[#allocation6 + $0x70] sm:$0xff] }
  0x59   :  { %729 = vmatprep.subr.bf16.mxu0 %v728_v26  ;;  %757 = vmatprep.subr.bf16.mxu1 %v756_v29  ;;  %v800_v6 = vpack.c.bf16 %v302_v5, %v301_v4  ;;  %v304_v15 = vld [vmem:[#allocation6 + $0x78] sm:$0xff]  ;;  %v389_v17 = vld [vmem:[#allocation7] sm:$0xff]  ;;  %v390_v18 = vld [vmem:[#allocation7 + $0x8] sm:$0xff] }
  0x5a   :  { %v804_v16 = vpack.c.bf16 %v304_v15, %v303_v14  ;;  %v391_v19 = vld [vmem:[#allocation7 + $0x10] sm:$0xff]  ;;  %v808_v20 = vpack.c.bf16 %v390_v18, %v389_v17  ;;  %v392_v21 = vld [vmem:[#allocation7 + $0x18] sm:$0xff]  ;;  %v393_v23 = vld [vmem:[#allocation7 + $0x20] sm:$0xff] }
  0x5b   :  { %v812_v22 = vpack.c.bf16 %v392_v21, %v391_v19  ;;  %v394_v24 = vld [vmem:[#allocation7 + $0x28] sm:$0xff]  ;;  %v396_v27 = vld [vmem:[#allocation7 + $0x38] sm:$0xff]  ;;  %v498_v48 = vld [vmem:[%s1100_s6] ss:$0 sm:$0xff] }
  0x5c   :  { %731 = vmatpush3.bf16.msra.mxu0 %v728_v26  ;;  %759 = vmatpush3.bf16.msra.mxu1 %v756_v29  ;;  %v816_v25 = vpack.c.bf16 %v394_v24, %v393_v23  ;;  %v395_v26 = vld [vmem:[#allocation7 + $0x30] sm:$0xff]  ;;  %v397_v29 = vld [vmem:[#allocation7 + $0x40] sm:$0xff]  ;;  %v398_v30 = vld [vmem:[#allocation7 + $0x48] sm:$0xff] }
  0x5d   :  { %733 = vmatprep.subr.bf16.mxu0 %v732_v32  ;;  %761 = vmatprep.subr.bf16.mxu1 %v760_v35  ;;  %v820_v28 = vpack.c.bf16 %v396_v27, %v395_v26  ;;  %v824_v31 = vpack.c.bf16 %v398_v30, %v397_v29  ;;  %v400_v33 = vld [vmem:[#allocation7 + $0x58] sm:$0xff]  ;;  %v402_v36 = vld [vmem:[#allocation7 + $0x68] sm:$0xff] }
  0x60   :  { %735 = vmatpush3.bf16.msra.mxu0 %v732_v32  ;;  %763 = vmatpush3.bf16.msra.mxu1 %v760_v35  ;;  %v399_v32 = vld [vmem:[#allocation7 + $0x50] sm:$0xff]  ;;  %v401_v35 = vld [vmem:[#allocation7 + $0x60] sm:$0xff] }
  0x61   :  { %737 = vmatprep.subr.bf16.mxu0 %v736_v38  ;;  %765 = vmatprep.subr.bf16.mxu1 %v764_v41  ;;  %v828_v34 = vpack.c.bf16 %v400_v33, %v399_v32  ;;  %v832_v37 = vpack.c.bf16 %v402_v36, %v401_v35 }
  0x64   :  { %739 = vmatpush3.bf16.msra.mxu0 %v736_v38  ;;  %767 = vmatpush3.bf16.msra.mxu1 %v764_v41  ;;  %v497_v38 = vld [vmem:[%s1098_s4] ss:$0 sm:$0xff] }
  0x65   :  { %741 = vmatprep.subr.bf16.mxu0 %v740_v44  ;;  %769 = vmatprep.subr.bf16.mxu1 %v768_v45 }
  0x68   :  { %743 = vmatpush3.bf16.msra.mxu0 %v740_v44  ;;  %771 = vmatpush3.bf16.msra.mxu1 %v768_v45  ;;  %v403_v45 = vld [vmem:[#allocation7 + $0x70] sm:$0xff] }
  0x69   :  { %773 = vmatprep.subr.bf16.mxu1 %v772_v49  ;;  %777 = vmatprep.subr.bf16.mxu0 %v776_v53 }
  0x6b   :  { %605 = vmatmul.mubr.f32.vlgmr.msra.gmra.mrb[0].mxu0 %v88_v46  ;;  %v404_v46 = vld [vmem:[#allocation7 + $0x78] sm:$0xff] }
  0x6c   :  { %775 = vmatpush3.bf16.msra.mxu1 %v772_v49  ;;  %779 = vmatpush3.bf16.msra.mxu0 %v776_v53  ;;  %v836_v47 = vpack.c.bf16 %v404_v46, %v403_v45 }
  0x6d   :  { %781 = vmatprep.subr.bf16.mxu0 %v780_v55  ;;  %809 = vmatprep.subr.bf16.mxu1 %v808_v20 }
  0x70   :  { %783 = vmatpush3.bf16.msra.mxu0 %v780_v55  ;;  %v499_v55 = vld [vmem:[%s1102_s8] ss:$0 sm:$0xff] }
  0x71   :  { %785 = vmatprep.subr.bf16.mxu0 %v784_v58 }
  0x74   :  { %787 = vmatpush3.bf16.msra.mxu0 %v784_v58 }
  0x75   :  { %789 = vmatprep.subr.bf16.mxu0 %v788_v61 }
  0x78   :  { %791 = vmatpush3.bf16.msra.mxu0 %v788_v61 }
  0x79   :  { %793 = vmatprep.subr.bf16.mxu0 %v792_v0 }
  0x7c   :  { %795 = vmatpush3.bf16.msra.mxu0 %v792_v0 }
  0x7d   :  { %797 = vmatprep.subr.bf16.mxu0 %v796_v3 }
  0x80   :  { %799 = vmatpush3.bf16.msra.mxu0 %v796_v3 }
  0x81   :  { %801 = vmatprep.subr.bf16.mxu0 %v800_v6 }
  0x84   :  { %803 = vmatpush3.bf16.msra.mxu0 %v800_v6 }
  0x85   :  { %805 = vmatprep.subr.bf16.mxu0 %v804_v16 }
  0x88   :  { %807 = vmatpush3.bf16.msra.mxu0 %v804_v16 }
 0x13e   :  { %v606_v8 = vpop.f32.mrb[0].mxu0 }
 0x13f   :  { %v184_v9 = vadd.f32 %v606_v8, %v496_v7  ;;  %v178_v10 = vpop.f32.mrb[1].mxu0 }
 0x140   :  { %v179_v11 = vadd.f32 %v496_v7, %v178_v10 }
 0x141   :  { %v188_v13 = vmax.f32 %v184_v9, 0.0 }
 0x142   :  { %v187_v12 = vmax.f32 %v179_v11, 0.0 }
 0x144   :  { %639 = vmatprep.mubr.f32.mxu1 %v187_v12 }
 0x145   :  { %640 = vmatmul.mubr.f32.vlgmr.msra.gmra.mrb[0].mxu1 %v188_v13 }
 0x146   :  { %811 = vmatpush3.bf16.msra.mxu1 %v808_v20 }
 0x147   :  { %813 = vmatprep.subr.bf16.mxu1 %v812_v22 }
 0x14a   :  { %815 = vmatpush3.bf16.msra.mxu1 %v812_v22 }
 0x14b   :  { %817 = vmatprep.subr.bf16.mxu1 %v816_v25 }
 0x14e   :  { %819 = vmatpush3.bf16.msra.mxu1 %v816_v25 }
 0x14f   :  { %821 = vmatprep.subr.bf16.mxu1 %v820_v28 }
 0x152   :  { %823 = vmatpush3.bf16.msra.mxu1 %v820_v28 }
 0x153   :  { %825 = vmatprep.subr.bf16.mxu1 %v824_v31 }
 0x156   :  { %827 = vmatpush3.bf16.msra.mxu1 %v824_v31 }
 0x157   :  { %829 = vmatprep.subr.bf16.mxu1 %v828_v34 }
 0x15a   :  { %831 = vmatpush3.bf16.msra.mxu1 %v828_v34 }
 0x15b   :  { %833 = vmatprep.subr.bf16.mxu1 %v832_v37 }
 0x15e   :  { %835 = vmatpush3.bf16.msra.mxu1 %v832_v37 }
 0x15f   :  { %837 = vmatprep.subr.bf16.mxu1 %v836_v47 }
 0x162   :  { %839 = vmatpush3.bf16.msra.mxu1 %v836_v47 }
 0x218   :  { %v641_v39 = vpop.f32.mrb[0].mxu1 }
 0x219   :  { %v284_v40 = vadd.f32 %v641_v39, %v497_v38  ;;  %v278_v41 = vpop.f32.mrb[1].mxu1 }
 0x21a   :  { %v279_v42 = vadd.f32 %v497_v38, %v278_v41 }
 0x21b   :  { %v288_v44 = vmax.f32 %v284_v40, 0.0 }
 0x21c   :  { %v287_v43 = vmax.f32 %v279_v42, 0.0 }
 0x21e   :  { %674 = vmatprep.mubr.f32.mxu0 %v287_v43 }
 0x21f   :  { %675 = vmatmul.mubr.f32.vlgmr.msra.gmra.mrb[2].mxu0 %v288_v44 }
 0x2f2   :  { %v676_v49 = vpop.f32.mrb[2].mxu0 }
 0x2f3   :  { %v384_v50 = vadd.f32 %v676_v49, %v498_v48  ;;  %v378_v51 = vpop.f32.mrb[3].mxu0 }
 0x2f4   :  { %v379_v52 = vadd.f32 %v498_v48, %v378_v51 }
 0x2f5   :  { %v388_v54 = vmax.f32 %v384_v50, 0.0 }
 0x2f6   :  { %v387_v53 = vmax.f32 %v379_v52, 0.0 }
 0x2f8   :  { %709 = vmatprep.mubr.f32.mxu1 %v387_v53 }
 0x2f9   :  { %710 = vmatmul.mubr.f32.vlgmr.msra.gmra.mrb[2].mxu1 %v388_v54 }
 0x3cc   :  { %v711_v56 = vpop.f32.mrb[2].mxu1 }
 0x3cd   :  { %v484_v57 = vadd.f32 %v711_v56, %v499_v55  ;;  %v478_v58 = vpop.f32.mrb[3].mxu1 }
 0x3ce   :  { %v479_v59 = vadd.f32 %v499_v55, %v478_v58 }
 0x3cf   :  { %488 = vst [vmem:[%s1103_s9 + $0x8] sm:$0xff] %v484_v57 }
 0x3d0   :  { %487 = vst [vmem:[%s1103_s9] sm:$0xff] %v479_v59 }
 0x3d1   :  { %493 = vsyncpa [#allocation3], 1 }
 0x3d2   :  { %494 = vsyncpa [#allocation5], 1 }
 0x3d3   :  { %495 = vsyncpa [#allocation8], 1 }

</bundles_post_ra>
